<compile_context>
chip_gen: v7x
topology: tpu7x:2x2x1
jax: 0.10.0
libtpu: 0.0.40
codegen_flags: <defaults>
</compile_context>

<pallas_src>
import functools

import jax
import jax.numpy as jnp
from jax.experimental import pallas as pl
from jax.experimental.pallas import tpu as pltpu

IN_DIM = 64
H_DIM = 256
K = 5
Y_DIM = 10
SIG_MIN = 1e-4
SIG_MAX = None          # module default


def _round_up(x, m):
    return (x + m - 1) // m * m


# ----------------------------------------------------------------------------
# Fused kernel: one batch tile -> pi / mu / sigma heads
# ----------------------------------------------------------------------------
def _mol_kernel(x_ref, w1_ref, b1_ref,
                w2pi_ref, b2pi_ref,
                w2mu_ref, b2mu_ref,
                w2sg_ref, b2sg_ref,
                pi_ref, mu_ref, sig_ref,
                *, sig_min, sig_max):
    # First layer (all three heads at once): (tm, 64) @ (64, 768) -> (tm, 768)
    h = jnp.dot(x_ref[...], w1_ref[...], preferred_element_type=jnp.float32)
    h = jnp.maximum(h + b1_ref[...], 0.0)
    h = h.astype(w2pi_ref.dtype)                       # bf16 for second MXU pass

    h_pi = h[:, 0:H_DIM]                               # 256-aligned lane slices
    h_mu = h[:, H_DIM:2 * H_DIM]
    h_sg = h[:, 2 * H_DIM:3 * H_DIM]

    # pi head: linear -> softmax over the k logits (dim=1)
    pi_logit = jnp.dot(h_pi, w2pi_ref[...],
                       preferred_element_type=jnp.float32) + b2pi_ref[...]
    pi_max = jnp.max(pi_logit, axis=-1, keepdims=True)
    pi_e = jnp.exp(pi_logit - pi_max)
    pi_den = jnp.sum(pi_e, axis=-1, keepdims=True)
    pi_ref[...] = (pi_e / pi_den).astype(pi_ref.dtype)

    # mu head: linear -> clamp to [0, 1]
    mu = jnp.dot(h_mu, w2mu_ref[...],
                 preferred_element_type=jnp.float32) + b2mu_ref[...]
    mu_ref[...] = jnp.clip(mu, 0.0, 1.0).astype(mu_ref.dtype)

    # sigma head (shared across y_dim): linear -> sig_min + exp(.) (sig_max=None)
    sg = jnp.dot(h_sg, w2sg_ref[...],
                 preferred_element_type=jnp.float32) + b2sg_ref[...]
    if sig_max is None:
        sg = sig_min + jnp.exp(sg)
    else:
        sg = sig_min + (sig_max - sig_min) * jax.nn.sigmoid(sg)
    sig_ref[...] = sg.astype(sig_ref.dtype)


# ----------------------------------------------------------------------------
# Wrapper
# ----------------------------------------------------------------------------
def mixture_of_logits_forward(params, x, *, sig_min=SIG_MIN, sig_max=SIG_MAX):
    """x: (N, in_dim) f32 -> dict(pi=(N,k), mu=(N,k,y), sigma=(N,k,y))."""
    N = x.shape[0]
    tm = 128 if N >= 128 else _round_up(max(N, 1), 8)
    Mp = _round_up(N, tm)

    x_p = x.astype(jnp.bfloat16)
    if Mp != N:
        x_p = jnp.pad(x_p, ((0, Mp - N), (0, 0)))

    row = lambda i: (i, 0)      # batch-tiled operands / outputs
    full = lambda i: (0, 0)     # whole-array (VMEM-resident) weights & biases

    pi, mu2d, sig = pl.pallas_call(
        functools.partial(_mol_kernel, sig_min=sig_min, sig_max=sig_max),
        out_shape=(
            jax.ShapeDtypeStruct((Mp, K), jnp.float32),
            jax.ShapeDtypeStruct((Mp, K * Y_DIM), jnp.float32),
            jax.ShapeDtypeStruct((Mp, K), jnp.float32),
        ),
        grid_spec=pltpu.PrefetchScalarGridSpec(
            num_scalar_prefetch=0,
            grid=(Mp // tm,),
            in_specs=[
                pl.BlockSpec((tm, IN_DIM), row),           # x tile
                pl.BlockSpec((IN_DIM, 3 * H_DIM), full),   # W1_all (bf16)
                pl.BlockSpec((1, 3 * H_DIM), full),        # b1_all (f32)
                pl.BlockSpec((H_DIM, K), full),            # W2_pi
                pl.BlockSpec((1, K), full),                # b2_pi
                pl.BlockSpec((H_DIM, K * Y_DIM), full),    # W2_mu
                pl.BlockSpec((1, K * Y_DIM), full),        # b2_mu
                pl.BlockSpec((H_DIM, K), full),            # W2_sg
                pl.BlockSpec((1, K), full),                # b2_sg
            ],
            out_specs=[
                pl.BlockSpec((tm, K), row),
                pl.BlockSpec((tm, K * Y_DIM), row),
                pl.BlockSpec((tm, K), row),
            ],
        ),
        compiler_params=pltpu.CompilerParams(
            dimension_semantics=("parallel",)),
    )(x_p, params["w1"], params["b1"],
      params["w2_pi"], params["b2_pi"],
      params["w2_mu"], params["b2_mu"],
      params["w2_sg"], params["b2_sg"])

    pi = pi[:N]
    mu = mu2d[:N].reshape(N, K, Y_DIM)
    # SHARE_SIG=True: unsqueeze(-1).expand_as(mu).reshape(N,k,y) == broadcast
    sigma = jnp.broadcast_to(sig[:N, :, None], (N, K, Y_DIM))
    return {"pi": pi, "mu": mu, "sigma": sigma}


# ----------------------------------------------------------------------------
# Deterministic parameters (kaiming-normal weights, torch-style biases),
# pre-cast to bf16 and pre-concatenated once — no per-call weight preprocessing.
# ----------------------------------------------------------------------------
def init_params(key):
    ks = jax.random.split(key, 12)

    def kaiming(k, fan_in, fan_out):
        # torch kaiming_normal_ on (out,in) == N(0, 2/fan_in); stored as (in,out).
        return (jax.random.normal(k, (fan_in, fan_out), jnp.float32)
                * jnp.sqrt(2.0 / fan_in))

    def default_bias(k, fan_in, n):
        bound = 1.0 / jnp.sqrt(float(fan_in))
        return jax.random.uniform(k, (n,), jnp.float32, -bound, bound)

    # First-layer weights of the three heads, concatenated along the output dim.
    w1_pi = kaiming(ks[0], IN_DIM, H_DIM)
    w1_mu = kaiming(ks[1], IN_DIM, H_DIM)
    w1_sg = kaiming(ks[2], IN_DIM, H_DIM)
    b1_pi = default_bias(ks[3], IN_DIM, H_DIM)
    b1_mu = jax.random.uniform(ks[4], (H_DIM,), jnp.float32, 0.0, 1.0)  # fc_mu[0].bias ~ U(0,1)
    b1_sg = default_bias(ks[5], IN_DIM, H_DIM)

    w1 = jnp.concatenate([w1_pi, w1_mu, w1_sg], axis=1)                  # (64, 768)
    b1 = jnp.concatenate([b1_pi, b1_mu, b1_sg], axis=0).reshape(1, -1)   # (1, 768)

    # Second layers.
    w2_pi = kaiming(ks[6], H_DIM, K)
    b2_pi = default_bias(ks[7], H_DIM, K)
    w2_mu = kaiming(ks[8], H_DIM, K * Y_DIM)
    b2_mu = jax.random.uniform(ks[9], (K * Y_DIM,), jnp.float32, 0.0, 1.0)  # fc_mu[-1].bias ~ U(0,1)
    w2_sg = kaiming(ks[10], H_DIM, K)
    b2_sg = default_bias(ks[11], H_DIM, K)

    return dict(
        w1=w1.astype(jnp.bfloat16), b1=b1,
        w2_pi=w2_pi.astype(jnp.bfloat16), b2_pi=b2_pi.reshape(1, -1),
        w2_mu=w2_mu.astype(jnp.bfloat16), b2_mu=b2_mu.reshape(1, -1),
        w2_sg=w2_sg.astype(jnp.bfloat16), b2_sg=b2_sg.reshape(1, -1),
    )


if __name__ == "__main__":
    key = jax.random.PRNGKey(0)
    kp, kx = jax.random.split(key)
    params = init_params(kp)

    N = 8
    x = jax.random.normal(kx, (N, IN_DIM), jnp.float32)

    out = mixture_of_logits_forward(params, x)
    out = jax.tree_util.tree_map(jax.block_until_ready, out)

    assert out["pi"].shape == (N, K)
    assert out["mu"].shape == (N, K, Y_DIM)
    assert out["sigma"].shape == (N, K, Y_DIM)
    assert bool(jnp.allclose(jnp.sum(out["pi"], axis=-1), 1.0, atol=1e-3))
    assert bool(jnp.all((out["mu"] >= 0.0) & (out["mu"] <= 1.0)))
    assert bool(jnp.all(out["sigma"] >= SIG_MIN))
    # shared-sigma check: constant across y_dim
    assert bool(jnp.all(out["sigma"] == out["sigma"][:, :, :1]))
    print("KERNEL_OK")
</pallas_src>

<mosaic_0001>
module attributes {stable_mosaic.version = 11 : i64} {
  func.func @_mol_kernel(%arg0: i32, %arg1: memref<8x64xbf16, #tpu.memory_space<vmem>>, %arg2: memref<64x768xbf16, #tpu.memory_space<vmem>>, %arg3: memref<1x768xf32, #tpu.memory_space<vmem>>, %arg4: memref<256x5xbf16, #tpu.memory_space<vmem>>, %arg5: memref<1x5xf32, #tpu.memory_space<vmem>>, %arg6: memref<256x50xbf16, #tpu.memory_space<vmem>>, %arg7: memref<1x50xf32, #tpu.memory_space<vmem>>, %arg8: memref<256x5xbf16, #tpu.memory_space<vmem>>, %arg9: memref<1x5xf32, #tpu.memory_space<vmem>>, %arg10: memref<8x5xf32, #tpu.memory_space<vmem>>, %arg11: memref<8x50xf32, #tpu.memory_space<vmem>>, %arg12: memref<8x5xf32, #tpu.memory_space<vmem>>) attributes {dimension_semantics = [#tpu.dimension_semantics<parallel>], iteration_bounds = array<i64: 1>, scalar_prefetch = 0 : i64, scratch_operands = 0 : i64, tpu.core_type = #tpu.core_type<tc>, window_params = [{transform_indices = @transform_0, window_bounds = array<i64: 8, 64>}, {pipeline_mode = #tpu.pipeline_mode<synchronous>, transform_indices = @transform_1, window_bounds = array<i64: 64, 768>}, {pipeline_mode = #tpu.pipeline_mode<synchronous>, transform_indices = @transform_2, window_bounds = array<i64: 1, 768>}, {pipeline_mode = #tpu.pipeline_mode<synchronous>, transform_indices = @transform_3, window_bounds = array<i64: 256, 5>}, {pipeline_mode = #tpu.pipeline_mode<synchronous>, transform_indices = @transform_4, window_bounds = array<i64: 1, 5>}, {pipeline_mode = #tpu.pipeline_mode<synchronous>, transform_indices = @transform_5, window_bounds = array<i64: 256, 50>}, {pipeline_mode = #tpu.pipeline_mode<synchronous>, transform_indices = @transform_6, window_bounds = array<i64: 1, 50>}, {pipeline_mode = #tpu.pipeline_mode<synchronous>, transform_indices = @transform_7, window_bounds = array<i64: 256, 5>}, {pipeline_mode = #tpu.pipeline_mode<synchronous>, transform_indices = @transform_8, window_bounds = array<i64: 1, 5>}, {transform_indices = @transform_9, window_bounds = array<i64: 8, 5>}, {transform_indices = @transform_10, window_bounds = array<i64: 8, 50>}, {transform_indices = @transform_11, window_bounds = array<i64: 8, 5>}]} {
    %c0 = arith.constant 0 : index
    %c0_0 = arith.constant 0 : index
    %0 = vector.load %arg1[%c0, %c0_0] : memref<8x64xbf16, #tpu.memory_space<vmem>>, vector<8x64xbf16>
    %c0_1 = arith.constant 0 : index
    %c0_2 = arith.constant 0 : index
    %1 = vector.load %arg2[%c0_1, %c0_2] : memref<64x768xbf16, #tpu.memory_space<vmem>>, vector<64x768xbf16>
    %cst = arith.constant dense<0.000000e+00> : vector<8x768xf32>
    %2 = tpu.matmul %0, %1, %cst {dimension_numbers = #tpu.dot_dimension_numbers<[1], [0], [0], [1], [0, 0, 1, 1], [], []>} : vector<8x64xbf16>, vector<64x768xbf16>, vector<8x768xf32> -> vector<8x768xf32>
    %c0_3 = arith.constant 0 : index
    %c0_4 = arith.constant 0 : index
    %3 = vector.load %arg3[%c0_3, %c0_4] : memref<1x768xf32, #tpu.memory_space<vmem>>, vector<1x768xf32>
    %4 = vector.broadcast %3 : vector<1x768xf32> to vector<8x768xf32>
    %5 = arith.addf %2, %4 : vector<8x768xf32>
    %cst_5 = arith.constant 0.000000e+00 : f32
    %6 = vector.broadcast %cst_5 : f32 to vector<8x768xf32>
    %7 = arith.maximumf %5, %6 : vector<8x768xf32>
    %8 = arith.truncf %7 : vector<8x768xf32> to vector<8x768xbf16>
    %9 = vector.extract_strided_slice %8 {offsets = [0, 0], sizes = [8, 256], strides = [1, 1]} : vector<8x768xbf16> to vector<8x256xbf16>
    %10 = vector.extract_strided_slice %8 {offsets = [0, 256], sizes = [8, 256], strides = [1, 1]} : vector<8x768xbf16> to vector<8x256xbf16>
    %11 = vector.extract_strided_slice %8 {offsets = [0, 512], sizes = [8, 256], strides = [1, 1]} : vector<8x768xbf16> to vector<8x256xbf16>
    %c0_6 = arith.constant 0 : index
    %c0_7 = arith.constant 0 : index
    %12 = vector.load %arg4[%c0_6, %c0_7] : memref<256x5xbf16, #tpu.memory_space<vmem>>, vector<256x5xbf16>
    %cst_8 = arith.constant dense<0.000000e+00> : vector<8x5xf32>
    %13 = tpu.matmul %9, %12, %cst_8 {dimension_numbers = #tpu.dot_dimension_numbers<[1], [0], [0], [1], [0, 0, 1, 1], [], []>} : vector<8x256xbf16>, vector<256x5xbf16>, vector<8x5xf32> -> vector<8x5xf32>
    %c0_9 = arith.constant 0 : index
    %c0_10 = arith.constant 0 : index
    %14 = vector.load %arg5[%c0_9, %c0_10] : memref<1x5xf32, #tpu.memory_space<vmem>>, vector<1x5xf32>
    %15 = vector.broadcast %14 : vector<1x5xf32> to vector<8x5xf32>
    %16 = arith.addf %13, %15 : vector<8x5xf32>
    %cst_11 = arith.constant dense<0xFF800000> : vector<8xf32>
    %17 = vector.multi_reduction <maximumf>, %16, %cst_11 [1] : vector<8x5xf32> to vector<8xf32>
    %18 = vector.shape_cast %17 : vector<8xf32> to vector<8x1xf32>
    %19 = vector.broadcast %18 : vector<8x1xf32> to vector<8x5xf32>
    %20 = arith.subf %16, %19 : vector<8x5xf32>
    %21 = math.exp %20 : vector<8x5xf32>
    %cst_12 = arith.constant dense<0.000000e+00> : vector<8xf32>
    %22 = vector.multi_reduction <add>, %21, %cst_12 [1] : vector<8x5xf32> to vector<8xf32>
    %23 = vector.shape_cast %22 : vector<8xf32> to vector<8x1xf32>
    %24 = vector.broadcast %23 : vector<8x1xf32> to vector<8x5xf32>
    %25 = arith.divf %21, %24 : vector<8x5xf32>
    %c0_13 = arith.constant 0 : index
    %c0_14 = arith.constant 0 : index
    %26 = vector.load %arg10[%c0_13, %c0_14] : memref<8x5xf32, #tpu.memory_space<vmem>>, vector<8x5xf32>
    tpu.vector_store %arg10[%c0_13, %c0_14], %25 {strides = array<i32>} : memref<8x5xf32, #tpu.memory_space<vmem>>, vector<8x5xf32>,
    %c0_15 = arith.constant 0 : index
    %c0_16 = arith.constant 0 : index
    %27 = vector.load %arg6[%c0_15, %c0_16] : memref<256x50xbf16, #tpu.memory_space<vmem>>, vector<256x50xbf16>
    %cst_17 = arith.constant dense<0.000000e+00> : vector<8x50xf32>
    %28 = tpu.matmul %10, %27, %cst_17 {dimension_numbers = #tpu.dot_dimension_numbers<[1], [0], [0], [1], [0, 0, 1, 1], [], []>} : vector<8x256xbf16>, vector<256x50xbf16>, vector<8x50xf32> -> vector<8x50xf32>
    %c0_18 = arith.constant 0 : index
    %c0_19 = arith.constant 0 : index
    %29 = vector.load %arg7[%c0_18, %c0_19] : memref<1x50xf32, #tpu.memory_space<vmem>>, vector<1x50xf32>
    %30 = vector.broadcast %29 : vector<1x50xf32> to vector<8x50xf32>
    %31 = arith.addf %28, %30 : vector<8x50xf32>
    %cst_20 = arith.constant 0.000000e+00 : f32
    %cst_21 = arith.constant 1.000000e+00 : f32
    %32 = vector.broadcast %cst_20 : f32 to vector<8x50xf32>
    %33 = arith.maximumf %32, %31 : vector<8x50xf32>
    %34 = vector.broadcast %cst_21 : f32 to vector<8x50xf32>
    %35 = arith.minimumf %34, %33 : vector<8x50xf32>
    %c0_22 = arith.constant 0 : index
    %c0_23 = arith.constant 0 : index
    %36 = vector.load %arg11[%c0_22, %c0_23] : memref<8x50xf32, #tpu.memory_space<vmem>>, vector<8x50xf32>
    tpu.vector_store %arg11[%c0_22, %c0_23], %35 {strides = array<i32>} : memref<8x50xf32, #tpu.memory_space<vmem>>, vector<8x50xf32>,
    %c0_24 = arith.constant 0 : index
    %c0_25 = arith.constant 0 : index
    %37 = vector.load %arg8[%c0_24, %c0_25] : memref<256x5xbf16, #tpu.memory_space<vmem>>, vector<256x5xbf16>
    %cst_26 = arith.constant dense<0.000000e+00> : vector<8x5xf32>
    %38 = tpu.matmul %11, %37, %cst_26 {dimension_numbers = #tpu.dot_dimension_numbers<[1], [0], [0], [1], [0, 0, 1, 1], [], []>} : vector<8x256xbf16>, vector<256x5xbf16>, vector<8x5xf32> -> vector<8x5xf32>
    %c0_27 = arith.constant 0 : index
    %c0_28 = arith.constant 0 : index
    %39 = vector.load %arg9[%c0_27, %c0_28] : memref<1x5xf32, #tpu.memory_space<vmem>>, vector<1x5xf32>
    %40 = vector.broadcast %39 : vector<1x5xf32> to vector<8x5xf32>
    %41 = arith.addf %38, %40 : vector<8x5xf32>
    %42 = math.exp %41 : vector<8x5xf32>
    %cst_29 = arith.constant 9.99999974E-5 : f32
    %43 = vector.broadcast %cst_29 : f32 to vector<8x5xf32>
    %44 = arith.addf %43, %42 : vector<8x5xf32>
    %c0_30 = arith.constant 0 : index
    %c0_31 = arith.constant 0 : index
    %45 = vector.load %arg12[%c0_30, %c0_31] : memref<8x5xf32, #tpu.memory_space<vmem>>, vector<8x5xf32>
    tpu.vector_store %arg12[%c0_30, %c0_31], %44 {strides = array<i32>} : memref<8x5xf32, #tpu.memory_space<vmem>>, vector<8x5xf32>,
    return
  }
  func.func @transform_0(%arg0: i32) -> (i32, i32) {
    %c0_i32 = arith.constant 0 : i32
    %c0_i32_0 = arith.constant 0 : i32
    return %arg0, %c0_i32 : i32, i32
  }
  func.func @transform_1(%arg0: i32) -> (i32, i32) {
    %c0_i32 = arith.constant 0 : i32
    %c0_i32_0 = arith.constant 0 : i32
    %c0_i32_1 = arith.constant 0 : i32
    return %c0_i32, %c0_i32_0 : i32, i32
  }
  func.func @transform_2(%arg0: i32) -> (i32, i32) {
    %c0_i32 = arith.constant 0 : i32
    %c0_i32_0 = arith.constant 0 : i32
    %c0_i32_1 = arith.constant 0 : i32
    return %c0_i32, %c0_i32_0 : i32, i32
  }
  func.func @transform_3(%arg0: i32) -> (i32, i32) {
    %c0_i32 = arith.constant 0 : i32
    %c0_i32_0 = arith.constant 0 : i32
    %c0_i32_1 = arith.constant 0 : i32
    return %c0_i32, %c0_i32_0 : i32, i32
  }
  func.func @transform_4(%arg0: i32) -> (i32, i32) {
    %c0_i32 = arith.constant 0 : i32
    %c0_i32_0 = arith.constant 0 : i32
    %c0_i32_1 = arith.constant 0 : i32
    return %c0_i32, %c0_i32_0 : i32, i32
  }
  func.func @transform_5(%arg0: i32) -> (i32, i32) {
    %c0_i32 = arith.constant 0 : i32
    %c0_i32_0 = arith.constant 0 : i32
    %c0_i32_1 = arith.constant 0 : i32
    return %c0_i32, %c0_i32_0 : i32, i32
  }
  func.func @transform_6(%arg0: i32) -> (i32, i32) {
    %c0_i32 = arith.constant 0 : i32
    %c0_i32_0 = arith.constant 0 : i32
    %c0_i32_1 = arith.constant 0 : i32
    return %c0_i32, %c0_i32_0 : i32, i32
  }
  func.func @transform_7(%arg0: i32) -> (i32, i32) {
    %c0_i32 = arith.constant 0 : i32
    %c0_i32_0 = arith.constant 0 : i32
    %c0_i32_1 = arith.constant 0 : i32
    return %c0_i32, %c0_i32_0 : i32, i32
  }
  func.func @transform_8(%arg0: i32) -> (i32, i32) {
    %c0_i32 = arith.constant 0 : i32
    %c0_i32_0 = arith.constant 0 : i32
    %c0_i32_1 = arith.constant 0 : i32
    return %c0_i32, %c0_i32_0 : i32, i32
  }
  func.func @transform_9(%arg0: i32) -> (i32, i32) {
    %c0_i32 = arith.constant 0 : i32
    %c0_i32_0 = arith.constant 0 : i32
    return %arg0, %c0_i32 : i32, i32
  }
  func.func @transform_10(%arg0: i32) -> (i32, i32) {
    %c0_i32 = arith.constant 0 : i32
    %c0_i32_0 = arith.constant 0 : i32
    return %arg0, %c0_i32 : i32, i32
  }
  func.func @transform_11(%arg0: i32) -> (i32, i32) {
    %c0_i32 = arith.constant 0 : i32
    %c0_i32_0 = arith.constant 0 : i32
    return %arg0, %c0_i32 : i32, i32
  }
}

</mosaic_0001>

<bundles_post_ra>
// kernel: tpu_custom_call.1
= control target key start
LH: loop header
LB: loop body
LE: loop exit
PB: predicated region body
PF: predicated region fallthrough
CT: control target
= control target key end

     0   :  { %17 = vsyncpa [#allocation3], 0  ;;  %v1249_v2 = vmov 0   ;;  %vm215_vm0 = vcmask 523264   ;;  %s1595_s0 = inlined_call_operand.vmem [shape: bf16[8,64], index: 0, kind: input, shape index: {}]   ;;  %s1596_s1 = inlined_call_operand.vmem [shape: bf16[64,768], index: 1, kind: input, shape index: {}]   ;;  %s1597_s2 = inlined_call_operand.vmem [shape: f32[1,768], index: 2, kind: input, shape index: {}]   ;;  %s1598_s3 = inlined_call_operand.vmem [shape: bf16[256,5], index: 3, kind: input, shape index: {}]   ;;  %s1599_s4 = inlined_call_operand.vmem [shape: f32[1,5], index: 4, kind: input, shape index: {}]   ;;  %s1600_s5 = inlined_call_operand.vmem [shape: bf16[256,50], index: 5, kind: input, shape index: {}]   ;;  %s1601_s6 = inlined_call_operand.vmem [shape: f32[1,50], index: 6, kind: input, shape index: {}]   ;;  %s1602_s7 = inlined_call_operand.vmem [shape: bf16[256,5], index: 7, kind: input, shape index: {}]   ;;  %s1603_s8 = inlined_call_operand.vmem [shape: f32[1,5], index: 8, kind: input, shape index: {}]   ;;  %s1604_s9 = inlined_call_operand.hbm [shape: f32[8,5], index: 9, kind: output, shape index: {0}]   ;;  %s1605_s10 = inlined_call_operand.hbm [shape: f32[8,50], index: 10, kind: output, shape index: {1}]   ;;  %s1606_s11 = inlined_call_operand.hbm [shape: f32[8,5], index: 11, kind: output, shape index: {2}]  }
   0x1   :  { %v1089_v0 = vld [vmem:[%s1596_s1 + $0x4] ss:$24 sps:$4 sm:$0xff]   ;;  %v1091_v1 = vld [vmem:[%s1596_s1] ss:$24 sps:$4 sm:$0xff]   ;;  %251 = vmatprep.mubr.bf16.mxu0 %v1249_v2  ;;  %292 = vmatprep.mubr.bf16.mxu1 %v1249_v2  ;;  %v1092_v3 = vld [vmem:[%s1596_s1 + $0x34] ss:$24 sps:$4 sm:$0xff]  }
   0x2   :  { %219 = vmatprep.subr.bf16.mxu0 %v1089_v0  ;;  %v1094_v4 = vld [vmem:[%s1596_s1 + $0x30] ss:$24 sps:$4 sm:$0xff]   ;;  %v1095_v5 = vld [vmem:[%s1596_s1 + $0x64] ss:$24 sps:$4 sm:$0xff]   ;;  %v1097_v6 = vld [vmem:[%s1596_s1 + $0x60] ss:$24 sps:$4 sm:$0xff]  }
   0x3   :  { %220 = vmatpush1.bf16.msra.mxu0 %v1091_v1  ;;  %v1101_v7 = vld [vmem:[%s1596_s1 + $0xc] ss:$24 sps:$4 sm:$0xff]   ;;  %v1103_v8 = vld [vmem:[%s1596_s1 + $0x8] ss:$24 sps:$4 sm:$0xff]   ;;  %v1104_v9 = vld [vmem:[%s1596_s1 + $0x3c] ss:$24 sps:$4 sm:$0xff]  }
   0x4   :  { %221 = vmatprep.subr.bf16.mxu0 %v1092_v3  ;;  %v1098_v10 = vld [vmem:[%s1596_s1 + $0x94] ss:$24 sps:$4 sm:$0xff]   ;;  %260 = vmatprep.subr.bf16.mxu1 %v1101_v7  ;;  %v1106_v11 = vld [vmem:[%s1596_s1 + $0x38] ss:$24 sps:$4 sm:$0xff]   ;;  %v1109_v14 = vld [vmem:[%s1596_s1 + $0x68] ss:$24 sps:$4 sm:$0xff]  }
   0x5   :  { %261 = vmatpush1.bf16.msra.mxu1 %v1103_v8  ;;  %v1107_v12 = vld [vmem:[%s1596_s1 + $0x6c] ss:$24 sps:$4 sm:$0xff]   ;;  %v1100_v13 = vld [vmem:[%s1596_s1 + $0x90] ss:$24 sps:$4 sm:$0xff]   ;;  %v1110_v15 = vld [vmem:[%s1596_s1 + $0x9c] ss:$24 sps:$4 sm:$0xff]  }
   0x6   :  { %262 = vmatprep.subr.bf16.mxu1 %v1104_v9  ;;  %v38_v16 = vld [vmem:[%s1595_s0] sm:$0xf]  ;;  %v1112_v17 = vld [vmem:[%s1596_s1 + $0x98] ss:$24 sps:$4 sm:$0xff]   ;;  %v1115_v20 = vld [vmem:[%s1598_s3 + $0x48] sm:$0xff]  }
   0x7   :  { %222 = vmatpush1.bf16.msra.mxu0 %v1094_v4  ;;  %v1113_v18 = vld [vmem:[%s1598_s3 + $0x40] sm:$0xff]   ;;  %v1116_v21 = vld [vmem:[%s1598_s3 + $0x8] sm:$0xff]   ;;  %v1117_v22 = vld [vmem:[%s1598_s3 + $0x50] sm:$0xff]  }
   0x8   :  { %223 = vmatprep.subr.bf16.mxu0 %v1095_v5  ;;  %v1114_v19 = vld [vmem:[%s1598_s3] sm:$0xff]   ;;  %v1118_v23 = vld [vmem:[%s1598_s3 + $0x10] sm:$0xff]   ;;  %v1119_v24 = vld [vmem:[%s1598_s3 + $0x58] sm:$0xff]  }
   0x9   :  { %263 = vmatpush1.bf16.msra.mxu1 %v1106_v11  ;;  %v1120_v25 = vld [vmem:[%s1598_s3 + $0x18] sm:$0xff]   ;;  %v1121_v26 = vld [vmem:[%s1598_s3 + $0x60] sm:$0xff]   ;;  %v1123_v28 = vld [vmem:[%s1598_s3 + $0x68] sm:$0xff]  }
   0xa   :  { %264 = vmatprep.subr.bf16.mxu1 %v1107_v12  ;;  %v1122_v27 = vld [vmem:[%s1598_s3 + $0x20] sm:$0xff]   ;;  %v1124_v29 = vld [vmem:[%s1598_s3 + $0x28] sm:$0xff]  }
   0xb   :  { %224 = vmatpush1.bf16.msra.mxu0 %v1097_v6 }
   0xc   :  { %225 = vmatprep.subr.bf16.mxu0 %v1098_v10 }
   0xd   :  { %265 = vmatpush1.bf16.msra.mxu1 %v1109_v14 }
   0xe   :  { %266 = vmatprep.subr.bf16.mxu1 %v1110_v15 }
   0xf   :  { %226 = vmatpush1.bf16.msra.mxu0 %v1100_v13 }
  0x11   :  { %267 = vmatpush1.bf16.msra.mxu1 %v1112_v17 }
  0x12   :  { %965 = vmatmul.mubr.msk.bf16.vlgmr.msra.gmra.mrb[0].mxu0 %vm215_vm0, %v38_v16  ;;  %1019 = vmatprep.subr.bf16.mxu1 %v1113_v18 }
  0x13   :  { %333 = vmatprep.mubr.bf16.mxu0 %v1249_v2 }
  0x14   :  { %966 = vmatmul.mubr.msk.bf16.vlgmr.msra.gmra.mrb[0].mxu1 %vm215_vm0, %v38_v16 }
  0x15   :  { %1020 = vmatpush3.bf16.msra.mxu1 %v1114_v19 }
  0x16   :  { %1021 = vmatprep.subr.bf16.mxu1 %v1115_v20 }
  0x19   :  { %1022 = vmatpush3.bf16.msra.mxu1 %v1116_v21 }
  0x1a   :  { %1023 = vmatprep.subr.bf16.mxu1 %v1117_v22 }
  0x1d   :  { %1024 = vmatpush3.bf16.msra.mxu1 %v1118_v23 }
  0x1e   :  { %1025 = vmatprep.subr.bf16.mxu1 %v1119_v24 }
  0x21   :  { %1026 = vmatpush3.bf16.msra.mxu1 %v1120_v25 }
  0x22   :  { %1027 = vmatprep.subr.bf16.mxu1 %v1121_v26 }
  0x25   :  { %1028 = vmatpush3.bf16.msra.mxu1 %v1122_v27 }
  0x26   :  { %1029 = vmatprep.subr.bf16.mxu1 %v1123_v28 }
  0x29   :  { %1030 = vmatpush3.bf16.msra.mxu1 %v1124_v29 }
  0x2a   :  { %18 = vsyncpa [#allocation5], 0  ;;  %v1125_v30 = vld [vmem:[%s1598_s3 + $0x70] sm:$0xff]   ;;  %v1127_v32 = vld [vmem:[%s1598_s3 + $0x78] sm:$0xff]   ;;  %v65_v58 = vlaneseq  ;;  %vm529_vm1 = vcmask 39936   ;;  %vm719_vm2 = vcmask 408576  }
  0x2b   :  { %v1126_v31 = vld [vmem:[%s1598_s3 + $0x30] sm:$0xff]   ;;  %1031 = vmatprep.subr.bf16.mxu1 %v1125_v30  ;;  %v1128_v33 = vld [vmem:[%s1598_s3 + $0x38] sm:$0xff]   ;;  %v1141_v42 = vld [vmem:[%s1600_s5 + $0x40] sm:$0xff]  }
  0x2c   :  { %v1129_v34 = vld [vmem:[%s1596_s1 + $0x10] ss:$24 sps:$4 sm:$0xff]   ;;  %v1131_v35 = vld [vmem:[%s1596_s1 + $0x14] ss:$24 sps:$4 sm:$0xff]   ;;  %v1134_v36 = vld [vmem:[%s1596_s1 + $0x44] ss:$24 sps:$4 sm:$0xff]  }
  0x2d   :  { %1032 = vmatpush3.bf16.msra.mxu1 %v1126_v31  ;;  %301 = vmatprep.subr.bf16.mxu0 %v1131_v35  ;;  %v1132_v37 = vld [vmem:[%s1596_s1 + $0x40] ss:$24 sps:$4 sm:$0xff]   ;;  %v1137_v38 = vld [vmem:[%s1596_s1 + $0x74] ss:$24 sps:$4 sm:$0xff]   ;;  %v1135_v39 = vld [vmem:[%s1596_s1 + $0x70] ss:$24 sps:$4 sm:$0xff]  }
  0x2e   :  { %1033 = vmatprep.subr.bf16.mxu1 %v1127_v32  ;;  %302 = vmatpush1.bf16.msra.mxu0 %v1129_v34  ;;  %v1140_v40 = vld [vmem:[%s1596_s1 + $0xa4] ss:$24 sps:$4 sm:$0xff]   ;;  %v1138_v41 = vld [vmem:[%s1596_s1 + $0xa0] ss:$24 sps:$4 sm:$0xff]   ;;  %v1143_v44 = vld [vmem:[%s1600_s5 + $0x48] sm:$0xff]   ;;  %v1487_v59 = vshrl.u32 %v65_v58, 7 }
  0x2f   :  { %303 = vmatprep.subr.bf16.mxu0 %v1134_v36  ;;  %v1142_v43 = vld [vmem:[%s1600_s5] sm:$0xff]   ;;  %v1144_v45 = vld [vmem:[%s1600_s5 + $0x8] sm:$0xff]   ;;  %v1145_v46 = vld [vmem:[%s1600_s5 + $0x50] sm:$0xff]  }
  0x30   :  { %v1146_v47 = vld [vmem:[%s1600_s5 + $0x10] sm:$0xff]   ;;  %v1147_v48 = vld [vmem:[%s1600_s5 + $0x58] sm:$0xff]   ;;  %v1149_v50 = vld [vmem:[%s1600_s5 + $0x60] sm:$0xff]   ;;  %v67_v60 = vsub.s32 0, %v1487_v59  ;;  %v71_v62 = vsub.s32 1, %v1487_v59  ;;  %v75_v1 = vsub.s32 2, %v1487_v59 }
  0x31   :  { %1034 = vmatpush3.bf16.msra.mxu1 %v1128_v33  ;;  %v1148_v49 = vld [vmem:[%s1600_s5 + $0x18] sm:$0xff]   ;;  %v1150_v51 = vld [vmem:[%s1600_s5 + $0x20] sm:$0xff]   ;;  %v1151_v52 = vld [vmem:[%s1600_s5 + $0x68] sm:$0xff]   ;;  %v79_v3 = vsub.s32 3, %v1487_v59  ;;  %v87_v30 = vsub.s32 5, %v1487_v59 }
  0x32   :  { %304 = vmatpush1.bf16.msra.mxu0 %v1132_v37  ;;  %v1152_v53 = vld [vmem:[%s1600_s5 + $0x28] sm:$0xff]   ;;  %v1153_v54 = vld [vmem:[%s1600_s5 + $0x70] sm:$0xff]   ;;  %v1155_v56 = vld [vmem:[%s1600_s5 + $0x78] sm:$0xff]  }
  0x33   :  { %305 = vmatprep.subr.bf16.mxu0 %v1137_v38  ;;  %v1154_v55 = vld [vmem:[%s1600_s5 + $0x30] sm:$0xff]   ;;  %v1156_v57 = vld [vmem:[%s1600_s5 + $0x38] sm:$0xff]   ;;  %v63_v61 = vld [vmem:[%s1597_s2] sm:$0x3f] }
  0x34   :  { %v68_v63 = vrot.slane %v63_v61, %v67_v60  ;;  %v72_v0 = vrot.slane %v63_v61, %v71_v62  ;;  %v76_v10 = vrot.slane %v63_v61, %v75_v1  ;;  %v80_v12 = vrot.slane %v63_v61, %v79_v3  ;;  %v1157_v25 = vld [vmem:[%s1602_s7 + $0x40] sm:$0xff]   ;;  %v1159_v27 = vld [vmem:[%s1602_s7 + $0x48] sm:$0xff]   ;;  %v1161_v29 = vld [vmem:[%s1602_s7 + $0x50] sm:$0xff]  }
  0x35   :  { %v1158_v26 = vld [vmem:[%s1602_s7] sm:$0xff]   ;;  %1063 = vmatprep.subr.bf16.mxu1 %v1157_v25  ;;  %v1160_v28 = vld [vmem:[%s1602_s7 + $0x8] sm:$0xff]   ;;  %v1162_v31 = vld [vmem:[%s1602_s7 + $0x10] sm:$0xff]   ;;  %v88_v33 = vrot.slane %v63_v61, %v87_v30 }
  0x36   :  { %306 = vmatpush1.bf16.msra.mxu0 %v1135_v39  ;;  %v1163_v32 = vld [vmem:[%s1602_s7 + $0x58] sm:$0xff]   ;;  %v1165_v36 = vld [vmem:[%s1602_s7 + $0x60] sm:$0xff]  }
  0x37   :  { %307 = vmatprep.subr.bf16.mxu0 %v1140_v40  ;;  %v1164_v34 = vld [vmem:[%s1602_s7 + $0x18] sm:$0xff]   ;;  %v83_v40 = vsub.s32 4, %v1487_v59 }
  0x3a   :  { %308 = vmatpush1.bf16.msra.mxu0 %v1138_v41 }
  0x3b   :  { %1041 = vmatprep.subr.bf16.mxu0 %v1141_v42  ;;  %v1166_v42 = vld [vmem:[%s1602_s7 + $0x20] sm:$0xff]  }
  0x3d   :  { %967 = vmatmul.mubr.msk.bf16.vlgmr.msra.gmra.mrb[4].mxu0 %vm215_vm0, %v38_v16 }
  0x3e   :  { %1042 = vmatpush3.bf16.msra.mxu0 %v1142_v43 }
  0x3f   :  { %1043 = vmatprep.subr.bf16.mxu0 %v1143_v44  ;;  %v1167_v44 = vld [vmem:[%s1602_s7 + $0x68] sm:$0xff]  }
  0x42   :  { %1044 = vmatpush3.bf16.msra.mxu0 %v1144_v45 }
  0x43   :  { %1045 = vmatprep.subr.bf16.mxu0 %v1145_v46  ;;  %v84_v46 = vrot.slane %v63_v61, %v83_v40 }
  0x46   :  { %1046 = vmatpush3.bf16.msra.mxu0 %v1146_v47  ;;  %v1168_v47 = vld [vmem:[%s1602_s7 + $0x28] sm:$0xff]  }
  0x47   :  { %1047 = vmatprep.subr.bf16.mxu0 %v1147_v48  ;;  %v1169_v48 = vld [vmem:[%s1602_s7 + $0x70] sm:$0xff]  }
  0x4a   :  { %1048 = vmatpush3.bf16.msra.mxu0 %v1148_v49 }
  0x4b   :  { %1049 = vmatprep.subr.bf16.mxu0 %v1149_v50  ;;  %v1170_v50 = vld [vmem:[%s1602_s7 + $0x30] sm:$0xff]  }
  0x4e   :  { %1050 = vmatpush3.bf16.msra.mxu0 %v1150_v51  ;;  %v1171_v51 = vld [vmem:[%s1602_s7 + $0x78] sm:$0xff]  }
  0x4f   :  { %1051 = vmatprep.subr.bf16.mxu0 %v1151_v52 }
  0x52   :  { %1052 = vmatpush3.bf16.msra.mxu0 %v1152_v53  ;;  %v1172_v53 = vld [vmem:[%s1602_s7 + $0x38] sm:$0xff]  }
  0x53   :  { %1053 = vmatprep.subr.bf16.mxu0 %v1153_v54 }
  0x56   :  { %1054 = vmatpush3.bf16.msra.mxu0 %v1154_v55 }
  0x57   :  { %1055 = vmatprep.subr.bf16.mxu0 %v1155_v56 }
  0x5a   :  { %1056 = vmatpush3.bf16.msra.mxu0 %v1156_v57  ;;  %v968_v57 = vld [vmem:[%s1599_s4] ss:$0 sm:$0xff] }
  0xe5   :  { %v253_v2 = vpop.f32.mrb[0].mxu0 }
  0xe6   :  { %v254_v4 = vadd.f32 %v253_v2, %v68_v63  ;;  %v255_v5 = vpop.f32.mrb[1].mxu0 }
  0xe7   :  { %v256_v6 = vadd.f32 %v255_v5, %v72_v0  ;;  %v257_v7 = vpop.f32.mrb[2].mxu0  ;;  %v294_v14 = vpop.f32.mrb[0].mxu1 }
  0xe8   :  { %v342_v8 = vmax.f32 %v254_v4, 0.0  ;;  %v258_v9 = vpop.f32.mrb[3].mxu0  ;;  %v295_v16 = vadd.f32 %v294_v14, %v76_v10  ;;  %v296_v17 = vpop.f32.mrb[1].mxu1  ;;  %v985_v4 = vld [vmem:[%s1601_s6] ss:$0 sm:$0xff]  ;;  %s1250_s6 = smov [#allocation4]  }
  0xe9   :  { %v343_v11 = vmax.f32 %v256_v6, 0.0  ;;  %v297_v18 = vadd.f32 %v296_v17, %v80_v12  ;;  %v298_v19 = vpop.f32.mrb[2].mxu1  ;;  %v1002_v17 = vld [vmem:[%s1603_s8] ss:$0 sm:$0xff]  ;;  %s916_s19 = sshll.u32 %s1250_s6, 4  ;;  %s917_s19 = int_to_ptr.vmem [resolvable:$true] %s916_s19 }
  0xea   :  { %v348_v15 = vpack.c.bf16 %v342_v8, %v342_v8  ;;  %v344_v20 = vmax.f32 %v295_v16, 0.0  ;;  %v299_v21 = vpop.f32.mrb[3].mxu1  ;;  %s1179_s20 = scalar_lea.vmem %s917_s19, 128  ;;  %p1184_p1 = scmp.lt.s32.totalorder %s917_s19, %s917_s19 }
  0xeb   :  { %v349_v13 = vpack.c.bf16 %v343_v11, %v343_v11  ;;  %v345_v22 = vmax.f32 %v297_v18, 0.0  ;;  %p1180_p0 = scmp.ne.s32.totalorder %s917_s19, %s1179_s20  ;;  %p1185_p2 = scmp.lt.s32.totalorder %s1179_s20, %s1179_s20 }
  0xec   :  { %v350_v23 = vpack.c.bf16 %v344_v20, %v344_v20 }
  0xed   :  { %521 = vmatprep.mubr.bf16.mxu1 %v349_v13  ;;  %v351_v24 = vpack.c.bf16 %v345_v22, %v345_v22  ;;  %p1186_p3 = por %p1185_p2, %p1184_p1 }
  0xee   :  { %522 = vmatmul.mubr.bf16.vlgmr.msra.gmra.mrb[4].mxu1 %v348_v15 }
  0xef   :  { %709 = vmatprep.mubr.bf16.mxu0 %v351_v24  ;;  %1064 = vmatpush3.bf16.msra.mxu1 %v1158_v26  ;;  %p1187_p4 = pnand %p1186_p3, %p1180_p0 }
  0xf0   :  { %710 = vmatmul.mubr.bf16.vlgmr.msra.gmra.mrb[8].mxu0 %v350_v23  ;;  %1065 = vmatprep.subr.bf16.mxu1 %v1159_v27 }
  0xf3   :  { %1066 = vmatpush3.bf16.msra.mxu1 %v1160_v28 }
  0xf4   :  { %1067 = vmatprep.subr.bf16.mxu1 %v1161_v29 }
  0xf7   :  { %1068 = vmatpush3.bf16.msra.mxu1 %v1162_v31 }
  0xf8   :  { %1069 = vmatprep.subr.bf16.mxu1 %v1163_v32 }
  0xfb   :  { %1070 = vmatpush3.bf16.msra.mxu1 %v1164_v34 }
  0xfc   :  { %1071 = vmatprep.subr.bf16.mxu1 %v1165_v36 }
  0xff   :  { %1072 = vmatpush3.bf16.msra.mxu1 %v1166_v42 }
 0x100   :  { %1073 = vmatprep.subr.bf16.mxu1 %v1167_v44 }
 0x103   :  { %1074 = vmatpush3.bf16.msra.mxu1 %v1168_v47 }
 0x104   :  { %1075 = vmatprep.subr.bf16.mxu1 %v1169_v48 }
 0x107   :  { %1076 = vmatpush3.bf16.msra.mxu1 %v1170_v50 }
 0x108   :  { %1077 = vmatprep.subr.bf16.mxu1 %v1171_v51 }
 0x10b   :  { %1078 = vmatpush3.bf16.msra.mxu1 %v1172_v53 }
 0x110   :  { %v335_v35 = vpop.f32.mrb[4].mxu0 }
 0x111   :  { %v337_v37 = vpop.f32.mrb[5].mxu0  ;;  %v336_v49 = vadd.f32 %v335_v35, %v84_v46 }
 0x112   :  { %v338_v38 = vadd.f32 %v337_v37, %v88_v33  ;;  %v339_v39 = vpop.f32.mrb[6].mxu0 }
 0x113   :  { %v340_v41 = vpop.f32.mrb[7].mxu0  ;;  %v346_v52 = vmax.f32 %v336_v49, 0.0 }
 0x114   :  { %v347_v43 = vmax.f32 %v338_v38, 0.0 }
 0x115   :  { %v352_v54 = vpack.c.bf16 %v346_v52, %v346_v52 }
 0x116   :  { %v353_v45 = vpack.c.bf16 %v347_v43, %v347_v43 }
 0x118   :  { %888 = vmatprep.mubr.bf16.mxu1 %v353_v45 }
 0x119   :  { %889 = vmatmul.mubr.bf16.vlgmr.msra.gmra.mrb[8].mxu1 %v352_v54 }
 0x1c1   :  { %v1035_v55 = vpop.f32.mrb[4].mxu1 }
 0x1c2   :  { %v1036_v56 = vpop.f32.mrb[5].mxu1 }
 0x1c3   :  { %v1037_v58 = vadd.f32 %v1036_v56, %v1035_v55  ;;  %v1038_v59 = vpop.f32.mrb[6].mxu1  ;;  %v1057_v63 = vpop.f32.mrb[8].mxu0 }
 0x1c4   :  { %v1039_v60 = vpop.f32.mrb[7].mxu1  ;;  %v1058_v0 = vpop.f32.mrb[9].mxu0 }
 0x1c5   :  { %v524_v61 = vadd.f32 %v1037_v58, %v968_v57  ;;  %v1059_v1 = vadd.f32 %v1058_v0, %v1057_v63  ;;  %v1060_v2 = vpop.f32.mrb[10].mxu0 }
 0x1c6   :  { %v1061_v3 = vpop.f32.mrb[11].mxu0 }
 0x1c7   :  { %v530_v62 = vsel %vm529_vm1, %v524_v61, -inf  ;;  %v712_v5 = vadd.f32 %v1059_v1, %v985_v4 }
 0x1c8   :  { %531 = vmax.xlane.f32.xlu0 %v530_v62 }
 0x1c9   :  { %v717_v6 = vmax.f32 %v712_v5, 0.0 }
 0x1cb   :  { %v718_v7 = vmin.f32 %v717_v6, 1.0 }
 0x1cd   :  { %720 = vst.msk [vmem:[#allocation4] sm:$0xff] %vm719_vm2, %v718_v7 }
 0x1ec   :  { %v1079_v8 = vpop.f32.mrb[8].mxu1 }
 0x1ed   :  { %v1080_v9 = vpop.f32.mrb[9].mxu1 }
 0x1ee   :  { %v1081_v10 = vadd.f32 %v1080_v9, %v1079_v8  ;;  %v1082_v11 = vpop.f32.mrb[10].mxu1 }
 0x1ef   :  { %v1083_v12 = vpop.f32.mrb[11].mxu1 }
 0x1f0   :  { %v891_v19 = vadd.f32 %v1081_v10, %v1002_v17 }
 0x1f2   :  { %v896_v20 = vmul.f32 1.442695, %v891_v19 }
 0x255   :  { %v532_v13 = vpop.xlane.xlu0 %531 }
 0x256   :  { %v533_v14 = vsub.f32 %v524_v61, %v532_v13 }
 0x258   :  { %v534_v15 = vmul.f32 1.442695, %v533_v14 }
 0x25a   :  { %1173 = vpow2.f32 %v534_v15 }
 0x25b   :  { %1175 = vpow2.f32 %v896_v20 }
 0x264   :  { %v1174_v16 = vpop.eup %1173 }
 0x265   :  { %v536_v18 = vsel %vm529_vm1, %v1174_v16, 0.0 }
 0x266   :  { %537 = vadd.xlane.f32.xlu0 %v536_v18 }
 0x267   :  { %1190 = shalt.err (!%p1187_p4)
}
 0x268   :  { %s1191_s8 = scalar_lea.hbm %s1605_s10, 128 }
 0x269   :  { %p1192_p5 = scmp.ne.s32.totalorder %s1605_s10, %s1191_s8  ;;  %p1195_p6 = scmp.lt.u32.totalorder %s1191_s8, %s1605_s10 }
 0x26b   :  { %p1197_p7 = pnand %p1195_p6, %p1192_p5 }
 0x26d   :  { %1200 = shalt.err (!%p1197_p7)
}
 0x26e   :  { %919 = dma.vmem_to_hbm [thread:$0]  %s917_s19, 128, %s1605_s10, [#allocation5]   ;;  %v1176_v21 = vpop.eup %1175 }
 0x26f   :  { %v898_v22 = vadd.f32 0.0001, %v1176_v21  ;;  %s1251_s28 = smov [#allocation6]  }
 0x270   :  { %s926_s29 = sshll.u32 %s1251_s28, 4  ;;  %s927_s29 = int_to_ptr.vmem [resolvable:$true] %s926_s29 }
 0x271   :  { %899 = vst.msk [vmem:[#allocation6] sm:$0xff] %vm529_vm1, %v898_v22  ;;  %s1201_s2 = scalar_lea.vmem %s927_s29, 128  ;;  %p1206_p9 = scmp.lt.s32.totalorder %s927_s29, %s927_s29 }
 0x272   :  { %p1202_p8 = scmp.ne.s32.totalorder %s927_s29, %s1201_s2  ;;  %p1207_p10 = scmp.lt.s32.totalorder %s1201_s2, %s1201_s2 }
 0x274   :  { %p1208_p11 = por %p1207_p10, %p1206_p9 }
 0x276   :  { %p1209_p12 = pnand %p1208_p11, %p1202_p8 }
 0x278   :  { %1212 = shalt.err (!%p1209_p12)
}
 0x279   :  { %s1213_s12 = scalar_lea.hbm %s1606_s11, 128 }
 0x27a   :  { %p1214_p13 = scmp.ne.s32.totalorder %s1606_s11, %s1213_s12  ;;  %p1217_p0 = scmp.lt.u32.totalorder %s1213_s12, %s1606_s11 }
 0x27c   :  { %p1219_p1 = pnand %p1217_p0, %p1214_p13 }
 0x27e   :  { %1222 = shalt.err (!%p1219_p1)
}
 0x27f   :  { %929 = dma.vmem_to_hbm [thread:$0]  %s927_s29, 128, %s1606_s11, [#allocation5]  }
 0x280   :  { %s1252_s0 = smov [#allocation2]  }
 0x281   :  { %s906_s7 = sshll.u32 %s1252_s0, 4  ;;  %s907_s7 = int_to_ptr.vmem [resolvable:$true] %s906_s7 }
 0x282   :  { %s1223_s17 = scalar_lea.vmem %s907_s7, 128  ;;  %p1228_p3 = scmp.lt.s32.totalorder %s907_s7, %s907_s7 }
 0x283   :  { %p1224_p2 = scmp.ne.s32.totalorder %s907_s7, %s1223_s17  ;;  %p1229_p4 = scmp.lt.s32.totalorder %s1223_s17, %s1223_s17 }
 0x285   :  { %p1230_p5 = por %p1229_p4, %p1228_p3 }
 0x287   :  { %p1231_p6 = pnand %p1230_p5, %p1224_p2 }
 0x2f3   :  { %v538_v23 = vpop.xlane.xlu0 %537 }
 0x2f4   :  { %1177 = vrcp.f32 %v538_v23 }
 0x2fe   :  { %v1178_v24 = vpop.eup %1177 }
 0x2ff   :  { %v540_v25 = vmul.f32 %v1178_v24, %v1174_v16 }
 0x301   :  { %541 = vst.msk [vmem:[#allocation2] sm:$0xff] %vm529_vm1, %v540_v25 }
 0x302   :  { %1234 = shalt.err (!%p1231_p6)
}
 0x303   :  { %s1235_s11 = scalar_lea.hbm %s1604_s9, 128 }
 0x304   :  { %p1236_p7 = scmp.ne.s32.totalorder %s1604_s9, %s1235_s11  ;;  %p1239_p8 = scmp.lt.u32.totalorder %s1235_s11, %s1604_s9 }
 0x306   :  { %p1241_p9 = pnand %p1239_p8, %p1236_p7 }
 0x308   :  { %1244 = shalt.err (!%p1241_p9)
}
 0x309   :  { %909 = dma.vmem_to_hbm [thread:$0]  %s907_s7, 128, %s1604_s9, [#allocation3]  }
 0x30a   :  { %1245 = dma.done.wait [#allocation3], 128  }
 0x30b   :  { %1246 = vsyncadd [#allocation3], 4294967168 }
 0x30c   :  { %1247 = dma.done.wait [#allocation5], 256  }
 0x30d   :  { %1248 = vsyncadd [#allocation5], 4294967040 }
 0x30e   :  { %939 = vsyncpa [#allocation3], 1 }
 0x30f   :  { %940 = vsyncpa [#allocation5], 1 }

</bundles_post_ra>
